<compile_context>
chip_gen: v6e
topology: v6e:2x2x1
jax: 0.10.0
libtpu: 0.0.40
codegen_flags: <defaults>
</compile_context>

<pallas_src>
import jax
import jax.numpy as jnp
from jax.experimental import pallas as pl
from jax.experimental.pallas import tpu as pltpu

NEG_SLOPE = 0.05  # LeakyReLU(alpha=0.05)


def _round_up(x, m):
    return ((x + m - 1) // m) * m


def _vmem_budget_bytes():
    # 3/4 of physical VMEM, capped at 100 MiB (v5e/v6e: 128 MiB, v7x: 64 MiB).
    try:
        cap = pltpu.get_tpu_info().vmem_capacity_bytes
    except Exception:
        cap = 64 * 1024 * 1024  # conservative fallback (v7x physical)
    return min((cap * 3) // 4, 100 * 1024 * 1024)


def _kernel_b_vmem_bytes(tm, nc, hp):
    resident = nc * hp * 2 + nc * 4                                   # xh bf16 + er row
    per_step = tm * nc * 1 + tm * nc * 2 + tm * hp * 4 + tm * 4       # adj + alpha + out + el
    return resident + 2 * per_step                                    # double-buffered


# --------------------------------------------------------------------------
# Kernel A: projection + attention-vector dot products (row-tiled)
# --------------------------------------------------------------------------
def project_kernel(x_ref, wt_ref, aw_ref, b_ref, xh_ref, el_ref, er_ref):
    x = x_ref[...]                                                    # (TMA, F) f32
    xh = jnp.dot(x, wt_ref[...], preferred_element_type=jnp.float32)  # (TMA, HP) f32
    xh_ref[...] = xh.astype(jnp.bfloat16)                             # bf16 writeback

    aw = aw_ref[...]                                                  # (2, HP)
    a_l = aw[0:1, :]                                                  # (1, HP)
    a_r = aw[1:2, :]                                                  # (1, HP)
    b = b_ref[0, 0]                                                   # SMEM scalar

    # el[i] = a_l . xh[i] + bias   (bias folded in here, once)
    el_ref[...] = jnp.sum(xh * a_l, axis=1, keepdims=True) + b        # (TMA, 1)

    # er[j] = a_r . xh[j], produced directly as a lane-dense (1, TMA) row.
    v = xh * a_r
    ones_row = jnp.ones((1, v.shape[1]), jnp.float32)
    er_ref[...] = jax.lax.dot_general(
        ones_row, v, (((1,), (1,)), ((), ())),
        preferred_element_type=jnp.float32)                           # (1, TMA)


# --------------------------------------------------------------------------
# Kernel B: row-tiled masked edge softmax + neighborhood aggregation
# --------------------------------------------------------------------------
def edge_softmax_kernel(el_ref, er_ref, adj_ref, xh_ref, alpha_ref, out_ref):
    # s[i, j] = el[i] + er[j]
    s = el_ref[...] + er_ref[...]                                     # (TM, NC) f32
    s = jnp.maximum(s, NEG_SLOPE * s)                                 # LeakyReLU(0.05)

    mask = adj_ref[...] != 0                                          # int8 compare, no f32 cast
    e = jnp.where(mask, jnp.exp(s), 0.0)                              # masked exp
    rowsum = jnp.sum(e, axis=1, keepdims=True)                        # h_sum per source
    rowsum = jnp.where(rowsum == 0.0, 1.0, rowsum)                    # empty rows -> 0 output
    inv = pl.reciprocal(rowsum, approx=True)                          # EUP, once per row
    alpha = e * inv                                                   # edge softmax

    alpha_bf = alpha.astype(jnp.bfloat16)
    alpha_ref[...] = alpha_bf                                         # bf16 lane-dense (TM, NC)
    # adjacency is binary, so (adj * alpha) == alpha  -> feed alpha straight in.
    out_ref[...] = jnp.dot(alpha_bf, xh_ref[...],
                           preferred_element_type=jnp.float32)        # bf16 MXU, f32 acc (TM, HP)


# --------------------------------------------------------------------------
# Wrapper
# --------------------------------------------------------------------------
def gat_layer_forward(x, adj_dense, w_fc, a_w, a_b, *, tm=512):
    """x: (N, F) f32, adj_dense: (N, N) 0/1, w_fc: (H, F), a_w: (1, 2H), a_b: (1,)."""
    N, F = x.shape
    H = w_fc.shape[0]
    HP = _round_up(H, 128)                         # lane-dense out store (H=32 -> 128)
    NC = _round_up(N, 128)                         # alpha/adj columns padded to 128 only

    vmem_budget = _vmem_budget_bytes()

    # Row tile: multiple of 128 (covers int8 sublane + bf16 alpha rows), shrink so
    # the tile fits the VMEM budget and there are >=2 tiles (dual-TC on v7x).
    tm_eff = max(128, (tm // 128) * 128)
    while tm_eff > 128 and (_kernel_b_vmem_bytes(tm_eff, NC, HP) > vmem_budget
                            or pl.cdiv(N, tm_eff) < 2):
        tm_eff = max(128, ((tm_eff // 2) // 128) * 128)

    NR = _round_up(N, tm_eff)                      # rows padded to a whole tile (NR >= NC)

    # ---- parameter / input padding (zeros are inert under the adj mask) ----
    wt = jnp.zeros((F, HP), jnp.float32).at[:, :H].set(w_fc.T.astype(jnp.float32))
    aw = jnp.zeros((2, HP), jnp.float32)
    aw = aw.at[0, :H].set(a_w[0, :H].astype(jnp.float32))   # a_left  (multiplies x[src])
    aw = aw.at[1, :H].set(a_w[0, H:].astype(jnp.float32))   # a_right (multiplies x[dst])
    b = a_b.reshape(1, 1).astype(jnp.float32)

    xp = jnp.zeros((NR, F), jnp.float32).at[:N, :].set(x.astype(jnp.float32))
    adj_i8 = jnp.zeros((NR, NC), jnp.int8).at[:N, :N].set(
        (adj_dense != 0).astype(jnp.int8))                   # 4x smaller HBM stream

    # ---- Kernel A: projection (row-tiled, pipelined) ----
    tma = tm_eff
    xh, el, er = pl.pallas_call(
        project_kernel,
        grid=(NR // tma,),
        in_specs=[
            pl.BlockSpec((tma, F), lambda i: (i, 0)),
            pl.BlockSpec((F, HP), lambda i: (0, 0)),
            pl.BlockSpec((2, HP), lambda i: (0, 0)),
            pl.BlockSpec(memory_space=pltpu.MemorySpace.SMEM),   # scalar bias in SMEM
        ],
        out_specs=[
            pl.BlockSpec((tma, HP), lambda i: (i, 0)),
            pl.BlockSpec((tma, 1), lambda i: (i, 0)),
            pl.BlockSpec((1, tma), lambda i: (0, i)),
        ],
        out_shape=[
            jax.ShapeDtypeStruct((NR, HP), jnp.bfloat16),
            jax.ShapeDtypeStruct((NR, 1), jnp.float32),
            jax.ShapeDtypeStruct((1, NR), jnp.float32),
        ],
        compiler_params=pltpu.CompilerParams(
            dimension_semantics=("parallel",),
            vmem_limit_bytes=vmem_budget,
        ),
    )(xp, wt, aw, b)

    # Column-shaped views for Kernel B (NR >= NC, both 128-multiples).
    xh_b = xh[:NC]            # (NC, HP) bf16, VMEM-resident in Kernel B
    er_b = er[:, :NC]         # (1, NC)

    # ---- Kernel B: row-tiled edge softmax + aggregation ----
    grid = (NR // tm_eff,)
    alpha_p, out_p = pl.pallas_call(
        edge_softmax_kernel,
        grid=grid,
        in_specs=[
            pl.BlockSpec((tm_eff, 1), lambda i: (i, 0)),    # el tile
            pl.BlockSpec((1, NC), lambda i: (0, 0)),        # er row   (resident, fetched once)
            pl.BlockSpec((tm_eff, NC), lambda i: (i, 0)),   # adj tile (int8, streamed)
            pl.BlockSpec((NC, HP), lambda i: (0, 0)),       # xh bf16  (resident, fetched once)
        ],
        out_specs=[
            pl.BlockSpec((tm_eff, NC), lambda i: (i, 0)),   # alpha tile (bf16, lane-dense)
            pl.BlockSpec((tm_eff, HP), lambda i: (i, 0)),   # out tile   (f32, lane-dense)
        ],
        out_shape=[
            jax.ShapeDtypeStruct((NR, NC), jnp.bfloat16),
            jax.ShapeDtypeStruct((NR, HP), jnp.float32),
        ],
        compiler_params=pltpu.CompilerParams(
            dimension_semantics=("parallel",),              # dual-TC sharding on v7x
            vmem_limit_bytes=vmem_budget,
        ),
    )(el, er_b, adj_i8, xh_b)

    out = out_p[:N, :H]
    alpha_dense = alpha_p[:N, :N].astype(jnp.float32)

    # Glue: per-edge alpha in coalesced (row-major) edge order, matching
    # torch.sparse coalesce().indices().  Eager (data-dependent E).
    # TODO(synk): the nonzero/gather of the ragged edge list stays in host-side JAX;
    #             a CSR/edge-index prefetch kernel would avoid the dense alpha store.
    src, dst = jnp.nonzero(adj_dense)
    alpha_edges = alpha_dense[src, dst]
    return out, alpha_edges


if __name__ == "__main__":
    key = jax.random.PRNGKey(0)
    N, F, H = 16, 8, 32
    k1, k2, k3, k4, k5 = jax.random.split(key, 5)

    # Inputs
    x = jax.random.normal(k1, (N, F), jnp.float32)
    adj = (jax.random.uniform(k2, (N, N)) < 0.3).astype(jnp.float32)
    adj = jnp.maximum(adj, jnp.eye(N, dtype=jnp.float32))   # self-loops

    # Parameters (shapes from GATLayer.__init__)
    w_fc = jax.random.normal(k3, (H, F), jnp.float32) * 0.1        # fc.weight (no bias)
    a_w = jax.random.normal(k4, (1, 2 * H), jnp.float32) * 0.1     # a.weight
    a_b = jax.random.normal(k5, (1,), jnp.float32) * 0.1           # a.bias

    out, alpha = gat_layer_forward(x, adj, w_fc, a_w, a_b)
    jax.block_until_ready((out, alpha))
    assert out.shape == (N, H)
    assert alpha.ndim == 1
    print("KERNEL_OK")
</pallas_src>

<mosaic_0001>
module attributes {stable_mosaic.version = 11 : i64} {
  func.func @project_kernel(%arg0: i32, %arg1: memref<128x8xf32, #tpu.memory_space<vmem>>, %arg2: memref<8x128xf32, #tpu.memory_space<vmem>>, %arg3: memref<2x128xf32, #tpu.memory_space<vmem>>, %arg4: memref<1x1xf32, #tpu.memory_space<smem>>, %arg5: memref<128x128xbf16, #tpu.memory_space<vmem>>, %arg6: memref<128x1xf32, #tpu.memory_space<vmem>>, %arg7: memref<1x128xf32, #tpu.memory_space<vmem>>) attributes {dimension_semantics = [#tpu.dimension_semantics<parallel>], iteration_bounds = array<i64: 1>, scalar_prefetch = 0 : i64, scratch_operands = 0 : i64, tpu.core_type = #tpu.core_type<tc>, window_params = [{transform_indices = @transform_0, window_bounds = array<i64: 128, 8>}, {pipeline_mode = #tpu.pipeline_mode<synchronous>, transform_indices = @transform_1, window_bounds = array<i64: 8, 128>}, {pipeline_mode = #tpu.pipeline_mode<synchronous>, transform_indices = @transform_2, window_bounds = array<i64: 2, 128>}, {transform_indices = @transform_3, window_bounds = array<i64: 1, 1>}, {transform_indices = @transform_4, window_bounds = array<i64: 128, 128>}, {transform_indices = @transform_5, window_bounds = array<i64: 128, 1>}, {transform_indices = @transform_6, window_bounds = array<i64: 1, 128>}]} {
    %c0 = arith.constant 0 : index
    %c0_0 = arith.constant 0 : index
    %0 = vector.load %arg1[%c0, %c0_0] : memref<128x8xf32, #tpu.memory_space<vmem>>, vector<128x8xf32>
    %c0_1 = arith.constant 0 : index
    %c0_2 = arith.constant 0 : index
    %1 = vector.load %arg2[%c0_1, %c0_2] : memref<8x128xf32, #tpu.memory_space<vmem>>, vector<8x128xf32>
    %cst = arith.constant dense<0.000000e+00> : vector<128x128xf32>
    %2 = tpu.matmul %0, %1, %cst {dimension_numbers = #tpu.dot_dimension_numbers<[1], [0], [0], [1], [0, 0, 1, 1], [], []>} : vector<128x8xf32>, vector<8x128xf32>, vector<128x128xf32> -> vector<128x128xf32>
    %3 = arith.truncf %2 : vector<128x128xf32> to vector<128x128xbf16>
    %c0_3 = arith.constant 0 : index
    %c0_4 = arith.constant 0 : index
    %4 = vector.load %arg5[%c0_3, %c0_4] : memref<128x128xbf16, #tpu.memory_space<vmem>>, vector<128x128xbf16>
    tpu.vector_store %arg5[%c0_3, %c0_4], %3 {strides = array<i32>} : memref<128x128xbf16, #tpu.memory_space<vmem>>, vector<128x128xbf16>,
    %c0_5 = arith.constant 0 : index
    %c0_6 = arith.constant 0 : index
    %5 = vector.load %arg3[%c0_5, %c0_6] : memref<2x128xf32, #tpu.memory_space<vmem>>, vector<2x128xf32>
    %6 = vector.extract_strided_slice %5 {offsets = [0, 0], sizes = [1, 128], strides = [1, 1]} : vector<2x128xf32> to vector<1x128xf32>
    %7 = vector.extract_strided_slice %5 {offsets = [1, 0], sizes = [1, 128], strides = [1, 1]} : vector<2x128xf32> to vector<1x128xf32>
    %c0_7 = arith.constant 0 : index
    %c0_8 = arith.constant 0 : index
    %8 = memref.load %arg4[%c0_7, %c0_8] : memref<1x1xf32, #tpu.memory_space<smem>>
    %9 = vector.broadcast %6 : vector<1x128xf32> to vector<128x128xf32>
    %10 = arith.mulf %2, %9 : vector<128x128xf32>
    %cst_9 = arith.constant dense<0.000000e+00> : vector<128xf32>
    %11 = vector.multi_reduction <add>, %10, %cst_9 [1] : vector<128x128xf32> to vector<128xf32>
    %12 = vector.shape_cast %11 : vector<128xf32> to vector<128x1xf32>
    %13 = vector.broadcast %8 : f32 to vector<128x1xf32>
    %14 = arith.addf %12, %13 : vector<128x1xf32>
    %c0_10 = arith.constant 0 : index
    %c0_11 = arith.constant 0 : index
    %15 = vector.load %arg6[%c0_10, %c0_11] : memref<128x1xf32, #tpu.memory_space<vmem>>, vector<128x1xf32>
    tpu.vector_store %arg6[%c0_10, %c0_11], %14 {strides = array<i32>} : memref<128x1xf32, #tpu.memory_space<vmem>>, vector<128x1xf32>,
    %16 = vector.broadcast %7 : vector<1x128xf32> to vector<128x128xf32>
    %17 = arith.mulf %2, %16 : vector<128x128xf32>
    %cst_12 = arith.constant 1.000000e+00 : f32
    %18 = vector.broadcast %cst_12 : f32 to vector<1x128xf32>
    %cst_13 = arith.constant dense<0.000000e+00> : vector<1x128xf32>
    %19 = tpu.matmul %18, %17, %cst_13 {dimension_numbers = #tpu.dot_dimension_numbers<[1], [1], [0], [0], [0, 0, 1, 0], [], []>} : vector<1x128xf32>, vector<128x128xf32>, vector<1x128xf32> -> vector<1x128xf32>
    %c0_14 = arith.constant 0 : index
    %c0_15 = arith.constant 0 : index
    %20 = vector.load %arg7[%c0_14, %c0_15] : memref<1x128xf32, #tpu.memory_space<vmem>>, vector<1x128xf32>
    tpu.vector_store %arg7[%c0_14, %c0_15], %19 {strides = array<i32>} : memref<1x128xf32, #tpu.memory_space<vmem>>, vector<1x128xf32>,
    return
  }
  func.func @transform_0(%arg0: i32) -> (i32, i32) {
    %c0_i32 = arith.constant 0 : i32
    %c0_i32_0 = arith.constant 0 : i32
    return %arg0, %c0_i32 : i32, i32
  }
  func.func @transform_1(%arg0: i32) -> (i32, i32) {
    %c0_i32 = arith.constant 0 : i32
    %c0_i32_0 = arith.constant 0 : i32
    %c0_i32_1 = arith.constant 0 : i32
    return %c0_i32, %c0_i32_0 : i32, i32
  }
  func.func @transform_2(%arg0: i32) -> (i32, i32) {
    %c0_i32 = arith.constant 0 : i32
    %c0_i32_0 = arith.constant 0 : i32
    %c0_i32_1 = arith.constant 0 : i32
    return %c0_i32, %c0_i32_0 : i32, i32
  }
  func.func @transform_3(%arg0: i32) -> (i32, i32) {
    %c0_i32 = arith.constant 0 : i32
    %c0_i32_0 = arith.constant 0 : i32
    %c0_i32_1 = arith.constant 0 : i32
    return %c0_i32, %c0_i32_0 : i32, i32
  }
  func.func @transform_4(%arg0: i32) -> (i32, i32) {
    %c0_i32 = arith.constant 0 : i32
    %c0_i32_0 = arith.constant 0 : i32
    return %arg0, %c0_i32 : i32, i32
  }
  func.func @transform_5(%arg0: i32) -> (i32, i32) {
    %c0_i32 = arith.constant 0 : i32
    %c0_i32_0 = arith.constant 0 : i32
    return %arg0, %c0_i32 : i32, i32
  }
  func.func @transform_6(%arg0: i32) -> (i32, i32) {
    %c0_i32 = arith.constant 0 : i32
    %c0_i32_0 = arith.constant 0 : i32
    return %c0_i32, %arg0 : i32, i32
  }
}

</mosaic_0001>

<bundles_post_ra>
// kernel: tpu_custom_call.1
= control target key start
LH: loop header
LB: loop body
LE: loop exit
PB: predicated region body
PF: predicated region fallthrough
CT: control target
= control target key end

     0   :  { %13 = vsyncpa [#allocation4], 0  ;;  %vm40_vm0 = vcmask 64512   ;;  %s1028_s0 = inlined_call_operand.vmem [shape: f32[128,8], index: 0, kind: input, shape index: {}]   ;;  %s1029_s1 = inlined_call_operand.vmem [shape: f32[8,128], index: 1, kind: input, shape index: {}]   ;;  %s1030_s2 = inlined_call_operand.vmem [shape: f32[2,128], index: 2, kind: input, shape index: {}]   ;;  %s1031_s3 = inlined_call_operand.<no memory space> [shape: f32[1,1], index: 3, kind: input, shape index: {}]   ;;  %s1032_s4 = inlined_call_operand.hbm [shape: bf16[128,128], index: 4, kind: output, shape index: {0}]   ;;  %s1033_s5 = inlined_call_operand.vmem [shape: f32[128,1], index: 5, kind: output, shape index: {1}]   ;;  %s1034_s6 = inlined_call_operand.hbm [shape: f32[1,128], index: 6, kind: output, shape index: {2}]  }
   0x1   :  { %v39_v0 = vld [vmem:[%s1029_s1] sm:$0xff]  ;;  %v24_v2 = vld [vmem:[%s1028_s0 + $0x8] sm:$0xff]  ;;  %v25_v3 = vld [vmem:[%s1028_s0 + $0x10] sm:$0xff] }
   0x2   :  { %v23_v1 = vld [vmem:[%s1028_s0] sm:$0xff]  ;;  %656 = vmatprep.subr.mxu0 %v39_v0  ;;  %v26_v4 = vld [vmem:[%s1028_s0 + $0x18] sm:$0xff] }
   0x3   :  { %658 = vmatprep.mubr.msk.f32.mxu0 %vm40_vm0, %v23_v1  ;;  %657 = vmatpush3.msra.mxu0 %v39_v0  ;;  %v27_v5 = vld [vmem:[%s1028_s0 + $0x20] sm:$0xff] }
   0x4   :  { %659 = vmatmul.mubr.msk.f32.vlgmr.msra.gmra.mxu0 %vm40_vm0, %v24_v2 }
   0x5   :  { %661 = vmatprep.mubr.msk.f32.mxu0 %vm40_vm0, %v25_v3 }
   0x6   :  { %14 = vsyncpa [#allocation6], 0  ;;  %v28_v6 = vld [vmem:[%s1028_s0 + $0x28] sm:$0xff]  ;;  %v29_v7 = vld [vmem:[%s1028_s0 + $0x30] sm:$0xff]  ;;  %v768_v17 = vmov 0.0   ;;  %vm769_vm1 = vmmov 0   ;;  %v316_v18 = vlaneseq }
   0x7   :  { %v30_v8 = vld [vmem:[%s1028_s0 + $0x38] sm:$0xff]  ;;  %v31_v9 = vld [vmem:[%s1028_s0 + $0x40] sm:$0xff]  ;;  %v32_v10 = vld [vmem:[%s1028_s0 + $0x48] sm:$0xff]  ;;  %682 = vmatprep.subr.mxu1 %v768_v17  ;;  %714 = vmatprep.mubr.msk.f32.mxu1 %vm769_vm1, %v768_v17  ;;  %vm385_vm2 = vcmask 7168   ;;  %s771_s20 = smov [#allocation3]  }
   0x8   :  { %662 = vmatmul.mubr.msk.f32.gmra.mxu0 %vm40_vm0, %v26_v4  ;;  %v33_v11 = vld [vmem:[%s1028_s0 + $0x50] sm:$0xff]  ;;  %v34_v12 = vld [vmem:[%s1028_s0 + $0x58] sm:$0xff]  ;;  %v35_v13 = vld [vmem:[%s1028_s0 + $0x60] sm:$0xff]  ;;  %v317_v19 = vshrl.u32 %v316_v18, 7  ;;  %v770_v18 = vmov 1.0   ;;  %s498_s21 = sshll.u32 %s771_s20, 4  ;;  %s499_s21 = int_to_ptr.vmem [resolvable:$true] %s498_s21 }
   0x9   :  { %664 = vmatprep.mubr.msk.f32.mxu0 %vm40_vm0, %v27_v5  ;;  %v36_v14 = vld [vmem:[%s1028_s0 + $0x68] sm:$0xff]  ;;  %v37_v15 = vld [vmem:[%s1028_s0 + $0x70] sm:$0xff]  ;;  %v38_v16 = vld [vmem:[%s1028_s0 + $0x78] sm:$0xff]  ;;  %s724_s26 = scalar_lea.vmem %s499_s21, 1024  ;;  %p729_p1 = scmp.lt.s32.totalorder %s499_s21, %s499_s21 }
   0xa   :  { %v318_v20 = vsub.s32 0, %v317_v19  ;;  %v314_v21 = vld [vmem:[%s1030_s2] sm:$0x3]  ;;  %v404_v50 = vsub.s32 1, %v317_v19  ;;  %v368_v19 = vstv %s1031_s3  ;;  %p725_p0 = scmp.ne.s32.totalorder %s499_s21, %s724_s26  ;;  %p730_p2 = scmp.lt.s32.totalorder %s724_s26, %s724_s26 }
   0xc   :  { %665 = vmatmul.mubr.msk.f32.gmra.mxu0 %vm40_vm0, %v28_v6  ;;  %v882_v22 = vrot.slane %v314_v21, %v318_v20  ;;  %v405_v56 = vrot.slane %v314_v21, %v404_v50  ;;  %p731_p3 = por %p730_p2, %p729_p1 }
   0xd   :  { %667 = vmatprep.mubr.msk.f32.mxu0 %vm40_vm0, %v29_v7 }
   0xe   :  { %p732_p4 = pnand %p731_p3, %p725_p0 }
  0x10   :  { %668 = vmatmul.mubr.msk.f32.gmra.mxu0 %vm40_vm0, %v30_v8 }
  0x11   :  { %670 = vmatprep.mubr.msk.f32.mxu0 %vm40_vm0, %v31_v9 }
  0x14   :  { %671 = vmatmul.mubr.msk.f32.gmra.mxu0 %vm40_vm0, %v32_v10 }
  0x15   :  { %673 = vmatprep.mubr.msk.f32.mxu0 %vm40_vm0, %v33_v11 }
  0x18   :  { %674 = vmatmul.mubr.msk.f32.gmra.mxu0 %vm40_vm0, %v34_v12 }
  0x19   :  { %676 = vmatprep.mubr.msk.f32.mxu0 %vm40_vm0, %v35_v13 }
  0x1c   :  { %677 = vmatmul.mubr.msk.f32.gmra.mxu0 %vm40_vm0, %v36_v14 }
  0x1d   :  { %679 = vmatprep.mubr.msk.f32.mxu0 %vm40_vm0, %v37_v15 }
  0x20   :  { %680 = vmatmul.mubr.msk.f32.gmra.mxu0 %vm40_vm0, %v38_v16 }
  0xc4   :  { %v884_v23 = vpop.f32.mrf.mxu0 }
  0xc5   :  { %v321_v24 = vmul.f32 %v884_v23, %v882_v22  ;;  %v407_v15 = vmul.f32 %v884_v23, %v405_v56 }
  0xc6   :  { %v888_v25 = vpop.f32.mrf.mxu0 }
  0xc7   :  { %v578_v26 = vpack.c.bf16 %v884_v23, %v888_v25  ;;  %338 = vadd.xlane.f32.xlu0 %v321_v24  ;;  %v320_v28 = vmul.f32 %v882_v22, %v888_v25  ;;  %v406_v16 = vmul.f32 %v405_v56, %v888_v25 }
  0xc8   :  { %v892_v27 = vpop.f32.mrf.mxu0 }
  0xc9   :  { %579 = vst [vmem:[#allocation3] sm:$0xff] %v578_v26   ;;  %v323_v29 = vmul.f32 %v892_v27, %v882_v22  ;;  %v409_v13 = vmul.f32 %v892_v27, %v405_v56 }
  0xca   :  { %v898_v30 = vpop.f32.mrf.mxu0 }
  0xcb   :  { %v583_v31 = vpack.c.bf16 %v892_v27, %v898_v30  ;;  %336 = vadd.xlane.f32.xlu0 %v320_v28  ;;  %342 = vadd.xlane.f32.xlu1 %v323_v29  ;;  %v322_v33 = vmul.f32 %v882_v22, %v898_v30  ;;  %v408_v14 = vmul.f32 %v405_v56, %v898_v30 }
  0xcc   :  { %v902_v32 = vpop.f32.mrf.mxu0 }
  0xcd   :  { %615 = vst [vmem:[#allocation3 + $0x8] sm:$0xff] %v583_v31   ;;  %v325_v38 = vmul.f32 %v902_v32, %v882_v22  ;;  %v411_v11 = vmul.f32 %v902_v32, %v405_v56 }
  0xce   :  { %v906_v34 = vpop.f32.mrf.mxu0 }
  0xcf   :  { %v588_v35 = vpack.c.bf16 %v902_v32, %v906_v34  ;;  %340 = vadd.xlane.f32.xlu1 %v322_v33  ;;  %v324_v36 = vmul.f32 %v882_v22, %v906_v34  ;;  %v410_v12 = vmul.f32 %v405_v56, %v906_v34 }
  0xd0   :  { %v912_v37 = vpop.f32.mrf.mxu0 }
  0xd1   :  { %616 = vst [vmem:[#allocation3 + $0x10] sm:$0xff] %v588_v35   ;;  %344 = vadd.xlane.f32.xlu0 %v324_v36  ;;  %v327_v43 = vmul.f32 %v912_v37, %v882_v22  ;;  %v413_v9 = vmul.f32 %v912_v37, %v405_v56 }
  0xd2   :  { %v916_v39 = vpop.f32.mrf.mxu0 }
  0xd3   :  { %v593_v40 = vpack.c.bf16 %v912_v37, %v916_v39  ;;  %346 = vadd.xlane.f32.xlu1 %v325_v38  ;;  %v326_v41 = vmul.f32 %v882_v22, %v916_v39  ;;  %v412_v10 = vmul.f32 %v405_v56, %v916_v39 }
  0xd4   :  { %v672_v42 = vpop.f32.mrf.mxu0 }
  0xd5   :  { %617 = vst [vmem:[#allocation3 + $0x18] sm:$0xff] %v593_v40   ;;  %348 = vadd.xlane.f32.xlu0 %v326_v41  ;;  %v329_v48 = vmul.f32 %v672_v42, %v882_v22  ;;  %v415_v7 = vmul.f32 %v672_v42, %v405_v56 }
  0xd6   :  { %v195_v44 = vpop.f32.mrf.mxu0 }
  0xd7   :  { %v598_v45 = vpack.c.bf16 %v672_v42, %v195_v44  ;;  %350 = vadd.xlane.f32.xlu1 %v327_v43  ;;  %v328_v46 = vmul.f32 %v882_v22, %v195_v44  ;;  %v414_v8 = vmul.f32 %v405_v56, %v195_v44 }
  0xd8   :  { %v675_v47 = vpop.f32.mrf.mxu0 }
  0xd9   :  { %618 = vst [vmem:[#allocation3 + $0x20] sm:$0xff] %v598_v45   ;;  %352 = vadd.xlane.f32.xlu0 %v328_v46  ;;  %v331_v54 = vmul.f32 %v675_v47, %v882_v22  ;;  %v417_v5 = vmul.f32 %v675_v47, %v405_v56 }
  0xda   :  { %v205_v49 = vpop.f32.mrf.mxu0 }
  0xdb   :  { %v603_v51 = vpack.c.bf16 %v675_v47, %v205_v49  ;;  %354 = vadd.xlane.f32.xlu1 %v329_v48  ;;  %v330_v52 = vmul.f32 %v882_v22, %v205_v49  ;;  %v416_v6 = vmul.f32 %v405_v56, %v205_v49 }
  0xdc   :  { %v678_v53 = vpop.f32.mrf.mxu0 }
  0xdd   :  { %619 = vst [vmem:[#allocation3 + $0x28] sm:$0xff] %v603_v51   ;;  %356 = vadd.xlane.f32.xlu0 %v330_v52  ;;  %v333_v60 = vmul.f32 %v678_v53, %v882_v22  ;;  %v419_v3 = vmul.f32 %v678_v53, %v405_v56 }
  0xde   :  { %v215_v55 = vpop.f32.mrf.mxu0 }
  0xdf   :  { %v608_v57 = vpack.c.bf16 %v678_v53, %v215_v55  ;;  %358 = vadd.xlane.f32.xlu1 %v331_v54  ;;  %v332_v58 = vmul.f32 %v882_v22, %v215_v55  ;;  %v418_v4 = vmul.f32 %v405_v56, %v215_v55 }
  0xe0   :  { %v681_v59 = vpop.f32.mrf.mxu0 }
  0xe1   :  { %620 = vst [vmem:[#allocation3 + $0x30] sm:$0xff] %v608_v57   ;;  %360 = vadd.xlane.f32.xlu0 %v332_v58  ;;  %v421_v61 = vmul.f32 %v681_v59, %v405_v56  ;;  %v335_v2 = vmul.f32 %v681_v59, %v882_v22 }
  0xe2   :  { %v225_v62 = vpop.f32.mrf.mxu0 }
  0xe3   :  { %v613_v63 = vpack.c.bf16 %v681_v59, %v225_v62  ;;  %362 = vadd.xlane.f32.xlu1 %v333_v60  ;;  %683 = vmatpush3.xpose.msra.mxu1 %v421_v61  ;;  %v334_v0 = vmul.f32 %v882_v22, %v225_v62  ;;  %v420_v1 = vmul.f32 %v405_v56, %v225_v62 }
  0xe4   :  { %684 = vmatprep.subr.mxu1 %v768_v17 }
  0xe5   :  { %621 = vst [vmem:[#allocation3 + $0x38] sm:$0xff] %v613_v63   ;;  %364 = vadd.xlane.f32.xlu0 %v334_v0 }
  0xe7   :  { %366 = vadd.xlane.f32.xlu1 %v335_v2  ;;  %685 = vmatpush3.xpose.msra.mxu1 %v420_v1 }
  0xe8   :  { %686 = vmatprep.subr.mxu1 %v768_v17 }
  0xeb   :  { %687 = vmatpush3.xpose.msra.mxu1 %v419_v3 }
  0xec   :  { %688 = vmatprep.subr.mxu1 %v768_v17 }
  0xef   :  { %689 = vmatpush3.xpose.msra.mxu1 %v418_v4 }
  0xf0   :  { %690 = vmatprep.subr.mxu1 %v768_v17 }
  0xf3   :  { %691 = vmatpush3.xpose.msra.mxu1 %v417_v5 }
  0xf4   :  { %692 = vmatprep.subr.mxu1 %v768_v17 }
  0xf7   :  { %693 = vmatpush3.xpose.msra.mxu1 %v416_v6 }
  0xf8   :  { %694 = vmatprep.subr.mxu1 %v768_v17 }
  0xfb   :  { %695 = vmatpush3.xpose.msra.mxu1 %v415_v7 }
  0xfc   :  { %696 = vmatprep.subr.mxu1 %v768_v17 }
  0xff   :  { %697 = vmatpush3.xpose.msra.mxu1 %v414_v8 }
 0x100   :  { %698 = vmatprep.subr.mxu1 %v768_v17 }
 0x103   :  { %699 = vmatpush3.xpose.msra.mxu1 %v413_v9 }
 0x104   :  { %700 = vmatprep.subr.mxu1 %v768_v17 }
 0x107   :  { %701 = vmatpush3.xpose.msra.mxu1 %v412_v10 }
 0x108   :  { %702 = vmatprep.subr.mxu1 %v768_v17 }
 0x10b   :  { %703 = vmatpush3.xpose.msra.mxu1 %v411_v11 }
 0x10c   :  { %704 = vmatprep.subr.mxu1 %v768_v17 }
 0x10f   :  { %705 = vmatpush3.xpose.msra.mxu1 %v410_v12 }
 0x110   :  { %706 = vmatprep.subr.mxu1 %v768_v17 }
 0x113   :  { %707 = vmatpush3.xpose.msra.mxu1 %v409_v13 }
 0x114   :  { %708 = vmatprep.subr.mxu1 %v768_v17 }
 0x117   :  { %709 = vmatpush3.xpose.msra.mxu1 %v408_v14 }
 0x118   :  { %710 = vmatprep.subr.mxu1 %v768_v17 }
 0x11b   :  { %711 = vmatpush3.xpose.msra.mxu1 %v407_v15 }
 0x11c   :  { %712 = vmatprep.subr.mxu1 %v768_v17 }
 0x11f   :  { %713 = vmatpush3.xpose.msra.mxu1 %v406_v16 }
 0x122   :  { %715 = vmatmul.mubr.f32.vlgmr.msra.gmra.mxu1 %v770_v18 }
 0x150   :  { %v339_v20 = vpop.xlane.xlu0 %338 }
 0x151   :  { %v370_v21 = vadd.f32 %v368_v19, %v339_v20 }
 0x153   :  { %387 = vst.msk [vmem:[%s1033_s5 + $0x8] sm:$0xff] %vm385_vm2, %v370_v21 }
 0x154   :  { %v337_v22 = vpop.xlane.xlu0 %336  ;;  %v343_v23 = vpop.xlane.xlu1 %342 }
 0x155   :  { %v369_v17 = vadd.f32 %v368_v19, %v337_v22  ;;  %v372_v24 = vadd.f32 %v368_v19, %v343_v23 }
 0x157   :  { %386 = vst.msk [vmem:[%s1033_s5] sm:$0xff] %vm385_vm2, %v369_v17  ;;  %389 = vst.msk [vmem:[%s1033_s5 + $0x18] sm:$0xff] %vm385_vm2, %v372_v24 }
 0x158   :  { %v341_v25 = vpop.xlane.xlu1 %340 }
 0x159   :  { %v371_v26 = vadd.f32 %v368_v19, %v341_v25 }
 0x15a   :  { %v345_v27 = vpop.xlane.xlu0 %344 }
 0x15b   :  { %388 = vst.msk [vmem:[%s1033_s5 + $0x10] sm:$0xff] %vm385_vm2, %v371_v26  ;;  %v373_v28 = vadd.f32 %v368_v19, %v345_v27 }
 0x15c   :  { %v347_v29 = vpop.xlane.xlu1 %346 }
 0x15d   :  { %390 = vst.msk [vmem:[%s1033_s5 + $0x20] sm:$0xff] %vm385_vm2, %v373_v28  ;;  %v374_v30 = vadd.f32 %v368_v19, %v347_v29 }
 0x15e   :  { %v349_v31 = vpop.xlane.xlu0 %348 }
 0x15f   :  { %391 = vst.msk [vmem:[%s1033_s5 + $0x28] sm:$0xff] %vm385_vm2, %v374_v30  ;;  %v375_v32 = vadd.f32 %v368_v19, %v349_v31 }
 0x160   :  { %v351_v33 = vpop.xlane.xlu1 %350 }
 0x161   :  { %392 = vst.msk [vmem:[%s1033_s5 + $0x30] sm:$0xff] %vm385_vm2, %v375_v32  ;;  %v376_v34 = vadd.f32 %v368_v19, %v351_v33 }
 0x162   :  { %v353_v35 = vpop.xlane.xlu0 %352 }
 0x163   :  { %393 = vst.msk [vmem:[%s1033_s5 + $0x38] sm:$0xff] %vm385_vm2, %v376_v34  ;;  %v377_v36 = vadd.f32 %v368_v19, %v353_v35 }
 0x164   :  { %v355_v37 = vpop.xlane.xlu1 %354 }
 0x165   :  { %394 = vst.msk [vmem:[%s1033_s5 + $0x40] sm:$0xff] %vm385_vm2, %v377_v36  ;;  %v378_v38 = vadd.f32 %v368_v19, %v355_v37 }
 0x166   :  { %735 = shalt.err (!%p732_p4)
}
 0x167   :  { %s772_s27 = smov 64   ;;  %s773_s28 = smov 4   ;;  %v357_v39 = vpop.xlane.xlu0 %356  ;;  %395 = vst.msk [vmem:[%s1033_s5 + $0x48] sm:$0xff] %vm385_vm2, %v378_v38 }
 0x168   :  { %504 = dma.vmem_to_hbm [thread:$0]  %s499_s21, 1024, %s1032_s4, [#allocation4], %s772_s27, %s772_s27, %s773_s28   ;;  %v379_v40 = vadd.f32 %v368_v19, %v357_v39  ;;  %v359_v41 = vpop.xlane.xlu1 %358 }
 0x169   :  { %v380_v42 = vadd.f32 %v368_v19, %v359_v41  ;;  %s774_s16 = smov [#allocation5]  }
 0x16a   :  { %396 = vst.msk [vmem:[%s1033_s5 + $0x50] sm:$0xff] %vm385_vm2, %v379_v40  ;;  %s513_s17 = sshll.u32 %s774_s16, 4  ;;  %s514_s17 = int_to_ptr.vmem [resolvable:$true] %s513_s17 }
 0x16b   :  { %v361_v43 = vpop.xlane.xlu0 %360  ;;  %397 = vst.msk [vmem:[%s1033_s5 + $0x58] sm:$0xff] %vm385_vm2, %v380_v42  ;;  %s744_s18 = scalar_lea.vmem %s514_s17, 16  ;;  %s748_s19 = scalar_lea.vmem %s514_s17, 32 }
 0x16c   :  { %v381_v44 = vadd.f32 %v368_v19, %v361_v43  ;;  %v363_v45 = vpop.xlane.xlu1 %362  ;;  %p745_p5 = scmp.ne.s32.totalorder %s514_s17, %s744_s18  ;;  %p749_p6 = scmp.lt.s32.totalorder %s514_s17, %s514_s17 }
 0x16d   :  { %v382_v46 = vadd.f32 %v368_v19, %v363_v45  ;;  %p750_p7 = scmp.lt.s32.totalorder %s748_s19, %s744_s18 }
 0x16e   :  { %398 = vst.msk [vmem:[%s1033_s5 + $0x60] sm:$0xff] %vm385_vm2, %v381_v44 }
 0x16f   :  { %v365_v47 = vpop.xlane.xlu0 %364  ;;  %399 = vst.msk [vmem:[%s1033_s5 + $0x68] sm:$0xff] %vm385_vm2, %v382_v46  ;;  %p751_p8 = por %p750_p7, %p749_p6 }
 0x170   :  { %v383_v48 = vadd.f32 %v368_v19, %v365_v47  ;;  %v367_v49 = vpop.xlane.xlu1 %366 }
 0x171   :  { %v384_v50 = vadd.f32 %v368_v19, %v367_v49  ;;  %p752_p9 = pnand %p751_p8, %p745_p5 }
 0x172   :  { %400 = vst.msk [vmem:[%s1033_s5 + $0x70] sm:$0xff] %vm385_vm2, %v383_v48 }
 0x173   :  { %401 = vst.msk [vmem:[%s1033_s5 + $0x78] sm:$0xff] %vm385_vm2, %v384_v50 }
 0x1e2   :  { %v488_v51 = vpop.f32.mrf.mxu1 }
 0x1e3   :  { %492 = vst [vmem:[#allocation5] sm:$0x1] %v488_v51 }
 0x1e4   :  { %v716_v52 = vpop.f32.mrf.mxu1 }
 0x1e5   :  { %755 = shalt.err (!%p752_p9)
}
 0x1e6   :  { %516 = dma.vmem_to_hbm [thread:$0]  %s514_s17, 16, %s1034_s6, [#allocation6]  }
 0x1e7   :  { %764 = dma.done.wait [#allocation4], 1024  }
 0x1e8   :  { %765 = vsyncadd [#allocation4], 4294966272 }
 0x1e9   :  { %766 = dma.done.wait [#allocation6], 16  }
 0x1ea   :  { %767 = vsyncadd [#allocation6], 4294967280 }
 0x1eb   :  { %525 = vsyncpa [#allocation4], 1 }
 0x1ec   :  { %526 = vsyncpa [#allocation6], 1 }

</bundles_post_ra>
